<compile_context>
chip_gen: v7x
topology: tpu7x:2x2x1
jax: 0.10.0
libtpu: 0.0.40
codegen_flags: <defaults>
</compile_context>

<pallas_src>
import functools

import jax
import jax.numpy as jnp
from jax.experimental import pallas as pl
from jax.experimental.pallas import tpu as pltpu


# ----------------------------------------------------------------------------
# Tile selection helpers
# ----------------------------------------------------------------------------
_ROW_TILES = (256, 128, 64, 32, 16, 8)   # sublane axis candidates (multiples of 8)
_LANE_TILES = (512, 256, 128)            # lane axis candidates (multiples of 128)
_K_TILES = (512, 256)                    # contraction tile candidates

_VMEM_LIMIT = 48 * 1024 * 1024           # safe on v5e/v6e (128 MiB) and v7x (64 MiB)


def _pick_tile(dim, candidates):
    """Largest candidate evenly dividing dim, else the full dim (always legal)."""
    for c in candidates:
        if dim >= c and dim % c == 0:
            return c
    return dim


# ----------------------------------------------------------------------------
# Kernel 1: tiled bias-free linear (VisionProjector)
# ----------------------------------------------------------------------------
def _matmul_kernel(x_ref, w_ref, o_ref, acc_ref):
    @pl.when(pl.program_id(2) == 0)
    def _():
        acc_ref[...] = jnp.zeros_like(acc_ref)

    acc_ref[...] += jnp.dot(x_ref[...], w_ref[...],
                            preferred_element_type=jnp.float32)

    @pl.when(pl.program_id(2) == pl.num_programs(2) - 1)
    def _():
        o_ref[...] = acc_ref[...].astype(o_ref.dtype)


def linear_no_bias(x2d, w):
    """y = x2d @ w with x2d [M, K], w [K, N]  (bias-free nn.Linear)."""
    M, K = x2d.shape
    K2, N = w.shape
    assert K == K2
    tm = _pick_tile(M, _ROW_TILES)
    tn = _pick_tile(N, _LANE_TILES)
    tk = _pick_tile(K, _K_TILES)
    grid = (M // tm, N // tn, K // tk)
    itemsize = x2d.dtype.itemsize
    cost = pl.CostEstimate(
        flops=2 * M * K * N,
        transcendentals=0,
        bytes_accessed=(M * K + K * N + M * N) * itemsize,
    )
    return pl.pallas_call(
        _matmul_kernel,
        out_shape=jax.ShapeDtypeStruct((M, N), x2d.dtype),
        grid_spec=pltpu.PrefetchScalarGridSpec(
            num_scalar_prefetch=0,
            grid=grid,
            in_specs=[
                pl.BlockSpec((tm, tk), lambda i, j, k: (i, k)),
                pl.BlockSpec((tk, tn), lambda i, j, k: (k, j)),
            ],
            out_specs=pl.BlockSpec((tm, tn), lambda i, j, k: (i, j)),
            scratch_shapes=[pltpu.VMEM((tm, tn), jnp.float32)],
        ),
        compiler_params=pltpu.CompilerParams(
            dimension_semantics=("parallel", "parallel", "arbitrary"),
            vmem_limit_bytes=_VMEM_LIMIT,
        ),
        cost_estimate=cost,
    )(x2d, w)


# ----------------------------------------------------------------------------
# Kernel 2: fused RMSNorm + lm_head (logits path)
# ----------------------------------------------------------------------------
def _norm_lmhead_kernel(x_ref, nw_ref, w_ref, o_ref, xn_sc, *, eps):
    # Compute the normalized row tile once per M-tile (j == 0) and cache it in
    # VMEM scratch; reuse it across all vocab tiles j.
    @pl.when(pl.program_id(1) == 0)
    def _():
        xf = x_ref[...].astype(jnp.float32)
        var = jnp.mean(xf * xf, axis=-1, keepdims=True)
        xn = xf * jax.lax.rsqrt(var + eps) * nw_ref[...].astype(jnp.float32)
        xn_sc[...] = xn.astype(xn_sc.dtype)

    o_ref[...] = jnp.dot(xn_sc[...], w_ref[...],
                         preferred_element_type=jnp.float32).astype(o_ref.dtype)


def norm_lm_head_logits(x2d, norm_w, lm_w, eps=1e-5):
    M, D = x2d.shape
    D2, V = lm_w.shape
    assert D == D2
    tm = _pick_tile(M, _ROW_TILES)
    tn = _pick_tile(V, _LANE_TILES)
    grid = (M // tm, V // tn)
    itemsize = x2d.dtype.itemsize
    cost = pl.CostEstimate(
        flops=2 * M * D * V,
        transcendentals=M,
        bytes_accessed=(M * D + D * V + M * V) * itemsize,
    )
    return pl.pallas_call(
        functools.partial(_norm_lmhead_kernel, eps=eps),
        out_shape=jax.ShapeDtypeStruct((M, V), x2d.dtype),
        grid_spec=pltpu.PrefetchScalarGridSpec(
            num_scalar_prefetch=0,
            grid=grid,
            in_specs=[
                pl.BlockSpec((tm, D), lambda i, j: (i, 0)),
                pl.BlockSpec((1, D), lambda i, j: (0, 0)),
                pl.BlockSpec((D, tn), lambda i, j: (0, j)),
            ],
            out_specs=pl.BlockSpec((tm, tn), lambda i, j: (i, j)),
            scratch_shapes=[pltpu.VMEM((tm, D), x2d.dtype)],
        ),
        compiler_params=pltpu.CompilerParams(
            # j must be sequential (xn_sc is computed at j==0); M tiles shard
            # across TensorCores on megacore parts.
            dimension_semantics=("parallel", "arbitrary"),
            vmem_limit_bytes=_VMEM_LIMIT,
        ),
        cost_estimate=cost,
    )(x2d, norm_w.reshape(1, D), lm_w)


# ----------------------------------------------------------------------------
# Kernel 3: fused RMSNorm + lm_head + online cross-entropy (loss path)
#           -> never materializes the [M, V] logits in HBM.
# ----------------------------------------------------------------------------
def _norm_lmhead_ce_kernel(x_ref, nw_ref, w_ref, lab_ref,
                           lse_ref, picked_ref,
                           xn_sc, m_sc, l_sc, p_sc, *, eps, tn):
    j = pl.program_id(1)

    @pl.when(j == 0)
    def _():
        xf = x_ref[...].astype(jnp.float32)
        var = jnp.mean(xf * xf, axis=-1, keepdims=True)
        xn = xf * jax.lax.rsqrt(var + eps) * nw_ref[...].astype(jnp.float32)
        xn_sc[...] = xn.astype(xn_sc.dtype)
        m_sc[...] = jnp.full_like(m_sc, -jnp.inf)
        l_sc[...] = jnp.zeros_like(l_sc)
        p_sc[...] = jnp.zeros_like(p_sc)

    # fp32 logits for this vocab tile (never written to HBM).
    logits = jnp.dot(xn_sc[...], w_ref[...], preferred_element_type=jnp.float32)

    # Pick the target-label logit if it falls inside this vocab tile.
    col = j * tn + jax.lax.broadcasted_iota(jnp.int32, logits.shape, 1)
    lab = lab_ref[...]                                    # [tm, 1] int32
    p_sc[...] += jnp.sum(jnp.where(col == lab, logits, 0.0),
                         axis=-1, keepdims=True)

    # Online logsumexp over the vocab axis.
    m_new = jnp.maximum(m_sc[...], jnp.max(logits, axis=-1, keepdims=True))
    l_sc[...] = (l_sc[...] * jnp.exp(m_sc[...] - m_new)
                 + jnp.sum(jnp.exp(logits - m_new), axis=-1, keepdims=True))
    m_sc[...] = m_new

    @pl.when(j == pl.num_programs(1) - 1)
    def _():
        lse_ref[...] = m_sc[...] + jnp.log(l_sc[...])
        picked_ref[...] = p_sc[...]


def norm_lm_head_ce(x2d, norm_w, lm_w, labels_flat, eps=1e-5):
    """Returns (logsumexp [M], picked_logit [M]) in fp32, labels -100 => picked 0."""
    M, D = x2d.shape
    D2, V = lm_w.shape
    assert D == D2
    tm = _pick_tile(M, _ROW_TILES)
    tn = _pick_tile(V, _LANE_TILES)
    grid = (M // tm, V // tn)
    lab2d = labels_flat.reshape(M, 1).astype(jnp.int32)
    itemsize = x2d.dtype.itemsize
    cost = pl.CostEstimate(
        flops=2 * M * D * V,
        transcendentals=M * V + M,
        bytes_accessed=(M * D + D * V) * itemsize + M * 12,
    )
    lse, picked = pl.pallas_call(
        functools.partial(_norm_lmhead_ce_kernel, eps=eps, tn=tn),
        out_shape=(jax.ShapeDtypeStruct((M, 1), jnp.float32),
                   jax.ShapeDtypeStruct((M, 1), jnp.float32)),
        grid_spec=pltpu.PrefetchScalarGridSpec(
            num_scalar_prefetch=0,
            grid=grid,
            in_specs=[
                pl.BlockSpec((tm, D), lambda i, j: (i, 0)),
                pl.BlockSpec((1, D), lambda i, j: (0, 0)),
                pl.BlockSpec((D, tn), lambda i, j: (0, j)),
                pl.BlockSpec((tm, 1), lambda i, j: (i, 0)),
            ],
            out_specs=[
                pl.BlockSpec((tm, 1), lambda i, j: (i, 0)),
                pl.BlockSpec((tm, 1), lambda i, j: (i, 0)),
            ],
            scratch_shapes=[
                pltpu.VMEM((tm, D), x2d.dtype),     # cached normalized rows
                pltpu.VMEM((tm, 1), jnp.float32),   # running max
                pltpu.VMEM((tm, 1), jnp.float32),   # running sum-exp
                pltpu.VMEM((tm, 1), jnp.float32),   # picked target logit
            ],
        ),
        compiler_params=pltpu.CompilerParams(
            dimension_semantics=("parallel", "arbitrary"),
            vmem_limit_bytes=_VMEM_LIMIT,
        ),
        cost_estimate=cost,
    )(x2d, norm_w.reshape(1, D), lm_w, lab2d)
    return lse[:, 0], picked[:, 0]


# ----------------------------------------------------------------------------
# Blinky forward (JAX glue around the Pallas kernels)
# ----------------------------------------------------------------------------
def blinky_forward(params, input_ids, vision_features=None,
                   attention_mask=None, labels=None):
    """Mirrors Blinky.forward.

    vision_features plays the role of `self.vision(pixel_values).last_hidden_state`
    ([B, num_image_tokens, vision_dim]); the Siglip backbone itself is not
    translated (see TODO at top of file).
    """
    B, T = input_ids.shape

    # text_model.embed_tokens (gather -- glue)
    x = params["embed_tokens"][input_ids]                      # [B, T, D]

    if vision_features is not None:
        Bv, Tv, Dv = vision_features.shape
        # VisionProjector: bias-free linear, tiled Pallas matmul.
        img = linear_no_bias(
            vision_features.reshape(Bv * Tv, Dv), params["vision_proj_w"]
        ).reshape(Bv, Tv, -1)                                   # [B, Tv, D]
        x = jnp.concatenate([img, x], axis=1)                   # [B, Tv+T, D]
        if attention_mask is not None:
            attention_mask = jnp.concatenate(
                [jnp.ones((B, Tv), dtype=jnp.bool_),
                 attention_mask.astype(jnp.bool_)], axis=1)
        if labels is not None:
            labels = jnp.concatenate(
                [jnp.full((B, Tv), -100, dtype=labels.dtype), labels], axis=1)

    # TODO(synk): self.text_model.layers (LLaMA decoder stack) not translated.

    Bx, Tx, D = x.shape
    x2d = x.reshape(Bx * Tx, D)

    if labels is not None:
        # Fused norm + lm_head + cross-entropy: logits never touch HBM.
        lab = labels.reshape(-1)
        lse, picked = norm_lm_head_ce(
            x2d, params["norm_w"], params["lm_head_w"], lab)
        valid = lab != -100
        nll = jnp.where(valid, lse - picked, 0.0)
        return jnp.sum(nll) / jnp.maximum(jnp.sum(valid), 1)

    # Inference path: fused norm + lm_head producing logits.
    logits = norm_lm_head_logits(x2d, params["norm_w"], params["lm_head_w"])
    return logits.reshape(Bx, Tx, -1)


# ----------------------------------------------------------------------------
# Pure-JAX reference (for correctness check) + params + smoke test
# ----------------------------------------------------------------------------
def _ref_forward(params, input_ids, vision_features, attention_mask,
                 labels=None, eps=1e-5):
    x = params["embed_tokens"][input_ids]
    img = vision_features @ params["vision_proj_w"]
    x = jnp.concatenate([img, x], axis=1)
    if labels is not None:
        labels = jnp.concatenate(
            [jnp.full((x.shape[0], vision_features.shape[1]), -100,
                      dtype=labels.dtype), labels], axis=1)
    xf = x.astype(jnp.float32)
    var = jnp.mean(xf * xf, axis=-1, keepdims=True)
    h = (xf * jax.lax.rsqrt(var + eps) * params["norm_w"]).astype(x.dtype)
    logits = h @ params["lm_head_w"]
    if labels is None:
        return logits
    V = logits.shape[-1]
    lf = logits.reshape(-1, V).astype(jnp.float32)
    lab = labels.reshape(-1)
    valid = lab != -100
    logz = jax.nn.logsumexp(lf, axis=-1)
    picked = jnp.take_along_axis(lf, jnp.where(valid, lab, 0)[:, None], axis=-1)[:, 0]
    nll = jnp.where(valid, logz - picked, 0.0)
    return jnp.sum(nll) / jnp.maximum(jnp.sum(valid), 1)


def make_params(key, vocab, embed_dim, vision_dim, dtype=jnp.float32):
    k0, k1, k2, _ = jax.random.split(key, 4)
    return {
        "embed_tokens": (jax.random.normal(k0, (vocab, embed_dim)) * 0.02).astype(dtype),
        "vision_proj_w": (jax.random.normal(k1, (vision_dim, embed_dim)) * 0.02).astype(dtype),
        "norm_w": jnp.ones((embed_dim,), dtype=dtype),
        "lm_head_w": (jax.random.normal(k2, (embed_dim, vocab)) * 0.02).astype(dtype),
    }


if __name__ == "__main__":
    # Small shapes: batch=2, seq=8, embed_dim=32, vision_dim=48,
    # num_image_tokens=4, vocab=64.
    B, T, D, DV, NIT, V = 2, 8, 32, 48, 4, 64
    dtype = jnp.float32

    key = jax.random.PRNGKey(0)
    kp, ki, kv, kl = jax.random.split(key, 4)

    params = make_params(kp, V, D, DV, dtype)
    input_ids = jax.random.randint(ki, (B, T), 0, V)
    vision_features = jax.random.normal(kv, (B, NIT, DV), dtype=dtype)
    attention_mask = jnp.ones((B, T), dtype=jnp.bool_)
    labels = jax.random.randint(kl, (B, T), 0, V)

    # logits path (labels=None)
    logits = blinky_forward(params, input_ids, vision_features, attention_mask)
    jax.block_until_ready(logits)
    assert logits.shape == (B, NIT + T, V), logits.shape
    logits_ref = _ref_forward(params, input_ids, vision_features, attention_mask)
    assert jnp.allclose(logits, logits_ref, rtol=1e-2, atol=1e-2), "logits mismatch"

    # loss path (labels provided) -- fused CE, no logits materialized
    loss = blinky_forward(params, input_ids, vision_features, attention_mask, labels)
    jax.block_until_ready(loss)
    assert loss.shape == (), loss.shape
    loss_ref = _ref_forward(params, input_ids, vision_features, attention_mask, labels)
    assert jnp.allclose(loss, loss_ref, rtol=1e-2, atol=1e-2), "loss mismatch"

    print("KERNEL_OK")
</pallas_src>

<mosaic_0001>
module attributes {stable_mosaic.version = 11 : i64} {
  func.func @_matmul_kernel(%arg0: i32, %arg1: i32, %arg2: i32, %arg3: memref<8x48xf32, #tpu.memory_space<vmem>>, %arg4: memref<48x32xf32, #tpu.memory_space<vmem>>, %arg5: memref<8x32xf32, #tpu.memory_space<vmem>>, %arg6: memref<8x32xf32, #tpu.memory_space<vmem>>) attributes {dimension_semantics = [#tpu.dimension_semantics<parallel>, #tpu.dimension_semantics<parallel>, #tpu.dimension_semantics<arbitrary>], iteration_bounds = array<i64: 1, 1, 1>, scalar_prefetch = 0 : i64, scratch_operands = 1 : i64, tpu.core_type = #tpu.core_type<tc>, window_params = [{transform_indices = @transform_0, window_bounds = array<i64: 8, 48>}, {transform_indices = @transform_1, window_bounds = array<i64: 48, 32>}, {transform_indices = @transform_2, window_bounds = array<i64: 8, 32>}]} {
    %c0_i32 = arith.constant 0 : i32
    %0 = arith.cmpi eq, %arg2, %c0_i32 : i32
    %1 = arith.extui %0 : i1 to i32
    %c0_i32_0 = arith.constant 0 : i32
    %2 = arith.cmpi ne, %1, %c0_i32_0 : i32
    scf.if %2 {
      %cst_10 = arith.constant 0.000000e+00 : f32
      %12 = vector.broadcast %cst_10 : f32 to vector<8x32xf32>
      %c0_11 = arith.constant 0 : index
      %c0_12 = arith.constant 0 : index
      %13 = vector.load %arg6[%c0_11, %c0_12] : memref<8x32xf32, #tpu.memory_space<vmem>>, vector<8x32xf32>
      tpu.vector_store %arg6[%c0_11, %c0_12], %12 {strides = array<i32>} : memref<8x32xf32, #tpu.memory_space<vmem>>, vector<8x32xf32>,
    } else {
    }
    %c0 = arith.constant 0 : index
    %c0_1 = arith.constant 0 : index
    %3 = vector.load %arg6[%c0, %c0_1] : memref<8x32xf32, #tpu.memory_space<vmem>>, vector<8x32xf32>
    %c0_2 = arith.constant 0 : index
    %c0_3 = arith.constant 0 : index
    %4 = vector.load %arg3[%c0_2, %c0_3] : memref<8x48xf32, #tpu.memory_space<vmem>>, vector<8x48xf32>
    %c0_4 = arith.constant 0 : index
    %c0_5 = arith.constant 0 : index
    %5 = vector.load %arg4[%c0_4, %c0_5] : memref<48x32xf32, #tpu.memory_space<vmem>>, vector<48x32xf32>
    %cst = arith.constant dense<0.000000e+00> : vector<8x32xf32>
    %6 = tpu.matmul %4, %5, %cst {dimension_numbers = #tpu.dot_dimension_numbers<[1], [0], [0], [1], [0, 0, 1, 1], [], []>} : vector<8x48xf32>, vector<48x32xf32>, vector<8x32xf32> -> vector<8x32xf32>
    %7 = arith.addf %3, %6 : vector<8x32xf32>
    %c0_6 = arith.constant 0 : index
    %c0_7 = arith.constant 0 : index
    %8 = vector.load %arg6[%c0_6, %c0_7] : memref<8x32xf32, #tpu.memory_space<vmem>>, vector<8x32xf32>
    tpu.vector_store %arg6[%c0_6, %c0_7], %7 {strides = array<i32>} : memref<8x32xf32, #tpu.memory_space<vmem>>, vector<8x32xf32>,
    %c0_i32_8 = arith.constant 0 : i32
    %9 = arith.cmpi eq, %arg2, %c0_i32_8 : i32
    %10 = arith.extui %9 : i1 to i32
    %c0_i32_9 = arith.constant 0 : i32
    %11 = arith.cmpi ne, %10, %c0_i32_9 : i32
    scf.if %11 {
      %c0_10 = arith.constant 0 : index
      %c0_11 = arith.constant 0 : index
      %12 = vector.load %arg6[%c0_10, %c0_11] : memref<8x32xf32, #tpu.memory_space<vmem>>, vector<8x32xf32>
      %c0_12 = arith.constant 0 : index
      %c0_13 = arith.constant 0 : index
      %13 = vector.load %arg5[%c0_12, %c0_13] : memref<8x32xf32, #tpu.memory_space<vmem>>, vector<8x32xf32>
      tpu.vector_store %arg5[%c0_12, %c0_13], %12 {strides = array<i32>} : memref<8x32xf32, #tpu.memory_space<vmem>>, vector<8x32xf32>,
    } else {
    }
    return
  }
  func.func @transform_0(%arg0: i32, %arg1: i32, %arg2: i32) -> (i32, i32) {
    %c0_i32 = arith.constant 0 : i32
    return %arg0, %arg2 : i32, i32
  }
  func.func @transform_1(%arg0: i32, %arg1: i32, %arg2: i32) -> (i32, i32) {
    %c0_i32 = arith.constant 0 : i32
    return %arg2, %arg1 : i32, i32
  }
  func.func @transform_2(%arg0: i32, %arg1: i32, %arg2: i32) -> (i32, i32) {
    %c0_i32 = arith.constant 0 : i32
    return %arg0, %arg1 : i32, i32
  }
}

</mosaic_0001>

<bundles_post_ra>
// kernel: tpu_custom_call.1
= control target key start
LH: loop header
LB: loop body
LE: loop exit
PB: predicated region body
PF: predicated region fallthrough
CT: control target
= control target key end

     0   :  { %vm16_vm0 = vcmask 261120   ;;  %v182_v3 = vmov 0.0|0.0   ;;  %v183_v6 = vmov 0.0   ;;  %vm184_vm1 = vmmov 0   ;;  %s237_s0 = inlined_call_operand.vmem [shape: f32[8,48], index: 0, kind: input, shape index: {}]   ;;  %s238_s1 = inlined_call_operand.vmem [shape: f32[48,32], index: 1, kind: input, shape index: {}]   ;;  %s239_s2 = inlined_call_operand.hbm [shape: f32[8,32], index: 2, kind: output, shape index: {}]  }
   0x1   :  { %v20_v0 = vld [vmem:[%s238_s1] sm:$0xff]  ;;  %v21_v1 = vld [vmem:[%s238_s1 + $0x8] sm:$0xff]  ;;  %v22_v2 = vld [vmem:[%s238_s1 + $0x10] sm:$0xff]  ;;  %145 = vmatprep.subr.bf16.mxu0 %v182_v3  ;;  %17 = vst.msk [vmem:[#allocation2] sm:$0xff] %vm16_vm0, %v183_v6  ;;  %142 = vmatprep.mubr.msk.f32.mxu0 %vm184_vm1, %v183_v6 }
   0x2   :  { %v146_v4 = vpack.c.bf16 %v21_v1, %v20_v0  ;;  %v23_v5 = vld [vmem:[%s238_s1 + $0x18] sm:$0xff] }
   0x3   :  { %7 = vsyncpa [#allocation4], 0  ;;  %v149_v7 = vpack.c.bf16 %v23_v5, %v22_v2  ;;  %v24_v8 = vld [vmem:[%s238_s1 + $0x20] sm:$0xff]  ;;  %v25_v9 = vld [vmem:[%s238_s1 + $0x28] sm:$0xff]  ;;  %vm26_vm2 = vcmask 392192   ;;  %s185_s23 = smov [#allocation3]  }
   0x4   :  { %147 = vmatpush3.bf16.msra.mxu0 %v146_v4  ;;  %v152_v10 = vpack.c.bf16 %v25_v9, %v24_v8  ;;  %v19_v11 = vld [vmem:[%s237_s0] sm:$0xff]  ;;  %s114_s24 = sshll.u32 %s185_s23, 4  ;;  %s115_s24 = int_to_ptr.vmem [resolvable:$true] %s114_s24 }
   0x5   :  { %148 = vmatprep.subr.bf16.mxu0 %v182_v3  ;;  %s158_s1 = scalar_lea.vmem %s115_s24, 128  ;;  %p163_p1 = scmp.lt.s32.totalorder %s115_s24, %s115_s24 }
   0x6   :  { %p159_p0 = scmp.ne.s32.totalorder %s115_s24, %s158_s1  ;;  %p164_p2 = scmp.lt.s32.totalorder %s158_s1, %s158_s1 }
   0x8   :  { %150 = vmatpush3.bf16.msra.mxu0 %v149_v7  ;;  %v18_v12 = vld [vmem:[#allocation2] sm:$0xff]  ;;  %p165_p3 = por %p164_p2, %p163_p1 }
   0x9   :  { %151 = vmatprep.subr.bf16.mxu0 %v182_v3 }
   0xa   :  { %p166_p4 = pnand %p165_p3, %p159_p0 }
   0xc   :  { %153 = vmatpush3.bf16.msra.mxu0 %v152_v10 }
   0xf   :  { %143 = vmatmul.mubr.msk.f32.vlgmr.msra.gmra.mrb[0].mxu0 %vm26_vm2, %v19_v11 }
  0xe2   :  { %v96_v13 = vpop.f32.mrb[0].mxu0 }
  0xe3   :  { %v100_v14 = vadd.f32 %v96_v13, %v18_v12  ;;  %v144_v15 = vpop.f32.mrb[1].mxu0 }
  0xe5   :  { %102 = vst.msk [vmem:[#allocation2] sm:$0xff] %vm16_vm0, %v100_v14 }
  0xec   :  { %v106_v16 = vld [vmem:[#allocation2] sm:$0xff] }
  0xed   :  { %107 = vst.msk [vmem:[#allocation3] sm:$0xff] %vm16_vm0, %v106_v16 }
  0xee   :  { %169 = shalt.err (!%p166_p4)
}
  0xef   :  { %s170_s26 = scalar_lea.hbm %s239_s2, 128 }
  0xf0   :  { %p171_p5 = scmp.ne.s32.totalorder %s239_s2, %s170_s26  ;;  %p174_p6 = scmp.lt.u32.totalorder %s170_s26, %s239_s2 }
  0xf2   :  { %p176_p7 = pnand %p174_p6, %p171_p5 }
  0xf4   :  { %179 = shalt.err (!%p176_p7)
}
  0xf5   :  { %117 = dma.vmem_to_hbm [thread:$0]  %s115_s24, 128, %s239_s2, [#allocation4]  }
  0xf6   :  { %180 = dma.done.wait [#allocation4], 128  }
  0xf7   :  { %181 = vsyncadd [#allocation4], 4294967168 }
  0xf8   :  { %121 = vsyncpa [#allocation4], 1 }

</bundles_post_ra>
